<compile_context>
chip_gen: v7x
topology: tpu7x:2x2x1
jax: 0.10.0
libtpu: 0.0.40
codegen_flags: <defaults>
</compile_context>

<pallas_src>
import jax
import jax.numpy as jnp
from jax import lax
from jax.experimental import pallas as pl
from jax.experimental.pallas import tpu as pltpu

HIDDEN_SIZE = 1
INPUT_SIZE = 1
OUTPUT_SIZE = 1

B_TILE = 128  # lane-dense batch tile


def simple_rnn_kernel(params_ref, x_ref, out_ref, h_scratch):
    # params_ref: SMEM (6,) f32 = [w_ih, w_hh, b_ih, b_hh, w_fc, b_fc]  (prefetched)
    # x_ref:      VMEM (T_CHUNK, B_TILE) f32  (time-major input chunk)
    # out_ref:    VMEM (1, B_TILE) f32        (fc output per batch lane)
    # h_scratch:  VMEM (1, B_TILE) f32        (hidden carry across time chunks)
    w_ih = params_ref[0]
    w_hh = params_ref[1]
    b_ih = params_ref[2]
    b_hh = params_ref[3]
    w_fc = params_ref[4]
    b_fc = params_ref[5]

    t_chunk = pl.program_id(1)
    n_chunks = pl.num_programs(1)
    tc = x_ref.shape[0]  # static chunk length

    @pl.when(t_chunk == 0)
    def _():
        h_scratch[...] = jnp.zeros_like(h_scratch)

    def step(t, h):
        x_t = x_ref[pl.ds(t, 1), :]  # (1, B_TILE)
        # h_t = tanh(x_t @ W_ih^T + b_ih + h_{t-1} @ W_hh^T + b_hh)
        return jnp.tanh(x_t * w_ih + b_ih + h * w_hh + b_hh)

    # h stays in vregs for the whole chunk; only one VMEM load/store per chunk.
    unroll = True if tc <= 128 else 8
    h_last = lax.fori_loop(0, tc, step, h_scratch[...], unroll=unroll)
    h_scratch[...] = h_last

    @pl.when(t_chunk == n_chunks - 1)
    def _():
        # fc on the last hidden state: out = h_T @ W_fc^T + b_fc
        out_ref[...] = h_last * w_fc + b_fc


def _pick_t_chunk(T, b_tile, budget_bytes=8 * 1024 * 1024):
    """Largest time-chunk that (a) divides T, (b) is a multiple of 8 (or == T),
    and (c) keeps double-buffered f32 x tiles comfortably inside scoped VMEM
    on every generation (incl. v7x's 64 MiB physical / 32 MiB scoped)."""
    per_row = b_tile * 4 * 2  # f32, double-buffered
    if T * per_row <= budget_bytes:
        return T
    max_rows = max(8, budget_bytes // per_row)
    best = None
    for c in range(8, min(T, max_rows) + 1, 8):
        if T % c == 0:
            best = c
    return best if best is not None else T


def simple_rnn_forward(x, params):
    """x: (B, T) float32 — same as the PyTorch input before unsqueeze(-1)."""
    B, T = x.shape
    b_pad = ((B + B_TILE - 1) // B_TILE) * B_TILE
    t_chunk = _pick_t_chunk(T, B_TILE)

    # Time-major, batch on the lane axis, padded to a full 128-lane tile.
    # (For production sizes, feed time-major data upstream to avoid this pass.)
    x_tm = jnp.pad(x, ((0, b_pad - B), (0, 0))).T  # (T, b_pad)

    grid = (b_pad // B_TILE, T // t_chunk)

    out = pl.pallas_call(
        simple_rnn_kernel,
        out_shape=jax.ShapeDtypeStruct((1, b_pad), jnp.float32),
        grid_spec=pltpu.PrefetchScalarGridSpec(
            num_scalar_prefetch=1,  # params -> SMEM, visible to index_maps too
            grid=grid,
            in_specs=[
                pl.BlockSpec((t_chunk, B_TILE), lambda b, t, p: (t, b)),
            ],
            out_specs=pl.BlockSpec((1, B_TILE), lambda b, t, p: (0, b)),
            scratch_shapes=[pltpu.VMEM((1, B_TILE), jnp.float32)],
        ),
        compiler_params=pltpu.CompilerParams(
            dimension_semantics=("parallel", "arbitrary"),
        ),
    )(params, x_tm)

    return out[0, :B].reshape(B, OUTPUT_SIZE)  # (batch, output_size)


def reference_forward(x, params):
    """Pure-JAX reference replicating the PyTorch forward."""
    w_ih, w_hh, b_ih, b_hh, w_fc, b_fc = (params[i] for i in range(6))
    B, T = x.shape
    h = jnp.zeros((B, HIDDEN_SIZE), jnp.float32)
    for t in range(T):
        x_t = x[:, t:t + 1]                       # (B, 1) — the unsqueeze(-1)
        h = jnp.tanh(x_t * w_ih + b_ih + h * w_hh + b_hh)
    return h * w_fc + b_fc                        # (B, 1)


if __name__ == "__main__":
    key = jax.random.PRNGKey(0)
    k_x, k_p = jax.random.split(key)

    batch, seq = 2, 8
    x = jax.random.normal(k_x, (batch, seq), dtype=jnp.float32)

    # PyTorch init: uniform(-1/sqrt(hidden), 1/sqrt(hidden)); hidden=1 → (-1, 1).
    params = jax.random.uniform(k_p, (6,), dtype=jnp.float32, minval=-1.0, maxval=1.0)

    out = jax.block_until_ready(simple_rnn_forward(x, params))
    ref = reference_forward(x, params)

    assert out.shape == (batch, OUTPUT_SIZE)
    assert jnp.allclose(out, ref, atol=1e-5, rtol=1e-5), (out, ref)
    print("KERNEL_OK")
</pallas_src>

<mosaic_0001>
module attributes {stable_mosaic.version = 11 : i64} {
  func.func @simple_rnn_kernel(%arg0: i32, %arg1: i32, %arg2: memref<6xf32, #tpu.memory_space<smem>>, %arg3: memref<8x128xf32, #tpu.memory_space<vmem>>, %arg4: memref<1x128xf32, #tpu.memory_space<vmem>>, %arg5: memref<1x128xf32, #tpu.memory_space<vmem>>) attributes {dimension_semantics = [#tpu.dimension_semantics<parallel>, #tpu.dimension_semantics<arbitrary>], iteration_bounds = array<i64: 1, 1>, scalar_prefetch = 1 : i64, scratch_operands = 1 : i64, tpu.core_type = #tpu.core_type<tc>, window_params = [{transform_indices = @transform_0, window_bounds = array<i64: 8, 128>}, {transform_indices = @transform_1, window_bounds = array<i64: 1, 128>}]} {
    %c0 = arith.constant 0 : index
    %0 = memref.load %arg2[%c0] : memref<6xf32, #tpu.memory_space<smem>>
    %c1 = arith.constant 1 : index
    %1 = memref.load %arg2[%c1] : memref<6xf32, #tpu.memory_space<smem>>
    %c2 = arith.constant 2 : index
    %2 = memref.load %arg2[%c2] : memref<6xf32, #tpu.memory_space<smem>>
    %c3 = arith.constant 3 : index
    %3 = memref.load %arg2[%c3] : memref<6xf32, #tpu.memory_space<smem>>
    %c4 = arith.constant 4 : index
    %4 = memref.load %arg2[%c4] : memref<6xf32, #tpu.memory_space<smem>>
    %c5 = arith.constant 5 : index
    %5 = memref.load %arg2[%c5] : memref<6xf32, #tpu.memory_space<smem>>
    %c0_i32 = arith.constant 0 : i32
    %6 = arith.cmpi eq, %arg1, %c0_i32 : i32
    %7 = arith.extui %6 : i1 to i32
    %c0_i32_0 = arith.constant 0 : i32
    %8 = arith.cmpi ne, %7, %c0_i32_0 : i32
    scf.if %8 {
      %cst = arith.constant 0.000000e+00 : f32
      %110 = vector.broadcast %cst : f32 to vector<1x128xf32>
      %c0_16 = arith.constant 0 : index
      %c0_17 = arith.constant 0 : index
      %111 = vector.load %arg5[%c0_16, %c0_17] : memref<1x128xf32, #tpu.memory_space<vmem>>, vector<1x128xf32>
      tpu.vector_store %arg5[%c0_16, %c0_17], %110 {strides = array<i32>} : memref<1x128xf32, #tpu.memory_space<vmem>>, vector<1x128xf32>,
    } else {
    }
    %c0_1 = arith.constant 0 : index
    %c0_2 = arith.constant 0 : index
    %9 = vector.load %arg5[%c0_1, %c0_2] : memref<1x128xf32, #tpu.memory_space<vmem>>, vector<1x128xf32>
    %c0_i32_3 = arith.constant 0 : i32
    %10 = arith.index_cast %c0_i32_3 : i32 to index
    %c0_4 = arith.constant 0 : index
    %11 = vector.load %arg3[%10, %c0_4] : memref<8x128xf32, #tpu.memory_space<vmem>>, vector<1x128xf32>
    %12 = vector.broadcast %0 : f32 to vector<1x128xf32>
    %13 = arith.mulf %11, %12 : vector<1x128xf32>
    %14 = vector.broadcast %2 : f32 to vector<1x128xf32>
    %15 = arith.addf %13, %14 : vector<1x128xf32>
    %16 = vector.broadcast %1 : f32 to vector<1x128xf32>
    %17 = arith.mulf %9, %16 : vector<1x128xf32>
    %18 = arith.addf %15, %17 : vector<1x128xf32>
    %19 = vector.broadcast %3 : f32 to vector<1x128xf32>
    %20 = arith.addf %18, %19 : vector<1x128xf32>
    %21 = math.tanh %20 : vector<1x128xf32>
    %c1_i32 = arith.constant 1 : i32
    %22 = arith.index_cast %c1_i32 : i32 to index
    %c0_5 = arith.constant 0 : index
    %23 = vector.load %arg3[%22, %c0_5] : memref<8x128xf32, #tpu.memory_space<vmem>>, vector<1x128xf32>
    %24 = vector.broadcast %0 : f32 to vector<1x128xf32>
    %25 = arith.mulf %23, %24 : vector<1x128xf32>
    %26 = vector.broadcast %2 : f32 to vector<1x128xf32>
    %27 = arith.addf %25, %26 : vector<1x128xf32>
    %28 = vector.broadcast %1 : f32 to vector<1x128xf32>
    %29 = arith.mulf %21, %28 : vector<1x128xf32>
    %30 = arith.addf %27, %29 : vector<1x128xf32>
    %31 = vector.broadcast %3 : f32 to vector<1x128xf32>
    %32 = arith.addf %30, %31 : vector<1x128xf32>
    %33 = math.tanh %32 : vector<1x128xf32>
    %c2_i32 = arith.constant 2 : i32
    %34 = arith.index_cast %c2_i32 : i32 to index
    %c0_6 = arith.constant 0 : index
    %35 = vector.load %arg3[%34, %c0_6] : memref<8x128xf32, #tpu.memory_space<vmem>>, vector<1x128xf32>
    %36 = vector.broadcast %0 : f32 to vector<1x128xf32>
    %37 = arith.mulf %35, %36 : vector<1x128xf32>
    %38 = vector.broadcast %2 : f32 to vector<1x128xf32>
    %39 = arith.addf %37, %38 : vector<1x128xf32>
    %40 = vector.broadcast %1 : f32 to vector<1x128xf32>
    %41 = arith.mulf %33, %40 : vector<1x128xf32>
    %42 = arith.addf %39, %41 : vector<1x128xf32>
    %43 = vector.broadcast %3 : f32 to vector<1x128xf32>
    %44 = arith.addf %42, %43 : vector<1x128xf32>
    %45 = math.tanh %44 : vector<1x128xf32>
    %c3_i32 = arith.constant 3 : i32
    %46 = arith.index_cast %c3_i32 : i32 to index
    %c0_7 = arith.constant 0 : index
    %47 = vector.load %arg3[%46, %c0_7] : memref<8x128xf32, #tpu.memory_space<vmem>>, vector<1x128xf32>
    %48 = vector.broadcast %0 : f32 to vector<1x128xf32>
    %49 = arith.mulf %47, %48 : vector<1x128xf32>
    %50 = vector.broadcast %2 : f32 to vector<1x128xf32>
    %51 = arith.addf %49, %50 : vector<1x128xf32>
    %52 = vector.broadcast %1 : f32 to vector<1x128xf32>
    %53 = arith.mulf %45, %52 : vector<1x128xf32>
    %54 = arith.addf %51, %53 : vector<1x128xf32>
    %55 = vector.broadcast %3 : f32 to vector<1x128xf32>
    %56 = arith.addf %54, %55 : vector<1x128xf32>
    %57 = math.tanh %56 : vector<1x128xf32>
    %c4_i32 = arith.constant 4 : i32
    %58 = arith.index_cast %c4_i32 : i32 to index
    %c0_8 = arith.constant 0 : index
    %59 = vector.load %arg3[%58, %c0_8] : memref<8x128xf32, #tpu.memory_space<vmem>>, vector<1x128xf32>
    %60 = vector.broadcast %0 : f32 to vector<1x128xf32>
    %61 = arith.mulf %59, %60 : vector<1x128xf32>
    %62 = vector.broadcast %2 : f32 to vector<1x128xf32>
    %63 = arith.addf %61, %62 : vector<1x128xf32>
    %64 = vector.broadcast %1 : f32 to vector<1x128xf32>
    %65 = arith.mulf %57, %64 : vector<1x128xf32>
    %66 = arith.addf %63, %65 : vector<1x128xf32>
    %67 = vector.broadcast %3 : f32 to vector<1x128xf32>
    %68 = arith.addf %66, %67 : vector<1x128xf32>
    %69 = math.tanh %68 : vector<1x128xf32>
    %c5_i32 = arith.constant 5 : i32
    %70 = arith.index_cast %c5_i32 : i32 to index
    %c0_9 = arith.constant 0 : index
    %71 = vector.load %arg3[%70, %c0_9] : memref<8x128xf32, #tpu.memory_space<vmem>>, vector<1x128xf32>
    %72 = vector.broadcast %0 : f32 to vector<1x128xf32>
    %73 = arith.mulf %71, %72 : vector<1x128xf32>
    %74 = vector.broadcast %2 : f32 to vector<1x128xf32>
    %75 = arith.addf %73, %74 : vector<1x128xf32>
    %76 = vector.broadcast %1 : f32 to vector<1x128xf32>
    %77 = arith.mulf %69, %76 : vector<1x128xf32>
    %78 = arith.addf %75, %77 : vector<1x128xf32>
    %79 = vector.broadcast %3 : f32 to vector<1x128xf32>
    %80 = arith.addf %78, %79 : vector<1x128xf32>
    %81 = math.tanh %80 : vector<1x128xf32>
    %c6_i32 = arith.constant 6 : i32
    %82 = arith.index_cast %c6_i32 : i32 to index
    %c0_10 = arith.constant 0 : index
    %83 = vector.load %arg3[%82, %c0_10] : memref<8x128xf32, #tpu.memory_space<vmem>>, vector<1x128xf32>
    %84 = vector.broadcast %0 : f32 to vector<1x128xf32>
    %85 = arith.mulf %83, %84 : vector<1x128xf32>
    %86 = vector.broadcast %2 : f32 to vector<1x128xf32>
    %87 = arith.addf %85, %86 : vector<1x128xf32>
    %88 = vector.broadcast %1 : f32 to vector<1x128xf32>
    %89 = arith.mulf %81, %88 : vector<1x128xf32>
    %90 = arith.addf %87, %89 : vector<1x128xf32>
    %91 = vector.broadcast %3 : f32 to vector<1x128xf32>
    %92 = arith.addf %90, %91 : vector<1x128xf32>
    %93 = math.tanh %92 : vector<1x128xf32>
    %c7_i32 = arith.constant 7 : i32
    %94 = arith.index_cast %c7_i32 : i32 to index
    %c0_11 = arith.constant 0 : index
    %95 = vector.load %arg3[%94, %c0_11] : memref<8x128xf32, #tpu.memory_space<vmem>>, vector<1x128xf32>
    %96 = vector.broadcast %0 : f32 to vector<1x128xf32>
    %97 = arith.mulf %95, %96 : vector<1x128xf32>
    %98 = vector.broadcast %2 : f32 to vector<1x128xf32>
    %99 = arith.addf %97, %98 : vector<1x128xf32>
    %100 = vector.broadcast %1 : f32 to vector<1x128xf32>
    %101 = arith.mulf %93, %100 : vector<1x128xf32>
    %102 = arith.addf %99, %101 : vector<1x128xf32>
    %103 = vector.broadcast %3 : f32 to vector<1x128xf32>
    %104 = arith.addf %102, %103 : vector<1x128xf32>
    %105 = math.tanh %104 : vector<1x128xf32>
    %c8_i32 = arith.constant 8 : i32
    %c0_12 = arith.constant 0 : index
    %c0_13 = arith.constant 0 : index
    %106 = vector.load %arg5[%c0_12, %c0_13] : memref<1x128xf32, #tpu.memory_space<vmem>>, vector<1x128xf32>
    tpu.vector_store %arg5[%c0_12, %c0_13], %105 {strides = array<i32>} : memref<1x128xf32, #tpu.memory_space<vmem>>, vector<1x128xf32>,
    %c0_i32_14 = arith.constant 0 : i32
    %107 = arith.cmpi eq, %arg1, %c0_i32_14 : i32
    %108 = arith.extui %107 : i1 to i32
    %c0_i32_15 = arith.constant 0 : i32
    %109 = arith.cmpi ne, %108, %c0_i32_15 : i32
    scf.if %109 {
      %110 = vector.broadcast %4 : f32 to vector<1x128xf32>
      %111 = arith.mulf %105, %110 : vector<1x128xf32>
      %112 = vector.broadcast %5 : f32 to vector<1x128xf32>
      %113 = arith.addf %111, %112 : vector<1x128xf32>
      %c0_16 = arith.constant 0 : index
      %c0_17 = arith.constant 0 : index
      %114 = vector.load %arg4[%c0_16, %c0_17] : memref<1x128xf32, #tpu.memory_space<vmem>>, vector<1x128xf32>
      tpu.vector_store %arg4[%c0_16, %c0_17], %113 {strides = array<i32>} : memref<1x128xf32, #tpu.memory_space<vmem>>, vector<1x128xf32>,
    } else {
    }
    return
  }
  func.func @transform_0(%arg0: i32, %arg1: i32, %arg2: memref<6xf32, #tpu.memory_space<smem>>) -> (i32, i32) {
    %c0_i32 = arith.constant 0 : i32
    return %arg1, %arg0 : i32, i32
  }
  func.func @transform_1(%arg0: i32, %arg1: i32, %arg2: memref<6xf32, #tpu.memory_space<smem>>) -> (i32, i32) {
    %c0_i32 = arith.constant 0 : i32
    %c0_i32_0 = arith.constant 0 : i32
    return %c0_i32, %arg0 : i32, i32
  }
}

</mosaic_0001>

<bundles_post_ra>
// kernel: tpu_custom_call.1
= control target key start
LH: loop header
LB: loop body
LE: loop exit
PB: predicated region body
PF: predicated region fallthrough
CT: control target
= control target key end

     0   :  { %s262_s0 = inlined_call_operand.hbm [shape: f32[6], index: 0, kind: input, shape index: {}]   ;;  %s263_s1 = inlined_call_operand.hbm [shape: f32[8,128], index: 1, kind: input, shape index: {}]   ;;  %s264_s2 = inlined_call_operand.hbm [shape: f32[1,128], index: 2, kind: output, shape index: {}]  }
   0x1   :  { %s147_s11 = scalar_lea.hbm %s262_s0, 16 }
   0x2   :  { %p148_p0 = scmp.ne.s32.totalorder %s262_s0, %s147_s11  ;;  %p151_p1 = scmp.lt.u32.totalorder %s147_s11, %s262_s0 }
   0x4   :  { %p153_p2 = pnand %p151_p1, %p148_p0 }
   0x6   :  { %156 = shalt.err (!%p153_p2)  }
   0x7   :  { %s207_s16 = smov [#allocation4]  }
   0x8   :  { %8 = dma.hbm_to_smem %s262_s0, 16, %s207_s16, [#allocation3] }
   0x9   :  { %201 = dma.done.wait [#allocation3], 16 }
   0xa   :  { %202 = vsyncadd [#allocation3], 4294967280 }
   0xb   :  { %10 = sfence }
   0xc   :  { %11 = vsyncpa [#allocation6], 0 }
   0xd   :  { %12 = vsyncpa [#allocation7], 0  ;;  %s208_s19 = smov [#allocation5]   ;;  %s157_s23 = scalar_lea.hbm %s263_s1, 128 }
   0xe   :  { %s19_s20 = sshll.u32 %s208_s19, 4  ;;  %p158_p3 = scmp.ne.s32.totalorder %s263_s1, %s157_s23  ;;  %s20_s20 = int_to_ptr.vmem [resolvable:$true] %s19_s20 }
   0xf   :  { %p161_p4 = scmp.lt.u32.totalorder %s157_s23, %s263_s1 }
  0x11   :  { %p163_p5 = pnand %p161_p4, %p158_p3 }
  0x13   :  { %166 = shalt.err (!%p163_p5)
}
  0x14   :  { %s167_s0 = scalar_lea.vmem %s20_s20, 128  ;;  %p172_p7 = scmp.lt.s32.totalorder %s20_s20, %s20_s20 }
  0x15   :  { %p168_p6 = scmp.ne.s32.totalorder %s20_s20, %s167_s0  ;;  %p173_p8 = scmp.lt.s32.totalorder %s167_s0, %s167_s0 }
  0x17   :  { %p174_p9 = por %p173_p8, %p172_p7 }
  0x19   :  { %p175_p10 = pnand %p174_p9, %p168_p6 }
  0x1b   :  { %178 = shalt.err (!%p175_p10)
}
  0x1c   :  { %22 = dma.hbm_to_vmem [thread:$0]  %s263_s1, 128, %s20_s20, [#allocation6]  }
  0x1d   :  { %203 = dma.done.wait [#allocation6], 128  }
  0x1e   :  { %204 = vsyncadd [#allocation6], 4294967168  ;;  %v209_v0 = vmov 0.0   ;;  %s26_s30 = sld [smem:[#allocation4]]  ;;  %s122_s3 = sld [smem:[#allocation4 + $0x1]] }
  0x1f   :  { %36 = vst [vmem:[#allocation2] sm:$0x1] %v209_v0  ;;  %s123_s4 = sld [smem:[#allocation4 + $0x2]]  ;;  %s124_s5 = sld [smem:[#allocation4 + $0x3]]  ;;  %v38_v1 = vld [vmem:[#allocation5] sm:$0x1] }
  0x20   :  { %v70_v7 = vld [vmem:[#allocation5 + $0x4] sm:$0x1]  ;;  %v77_v10 = vld [vmem:[#allocation5 + $0x5] sm:$0x1]  ;;  %v84_v11 = vld [vmem:[#allocation5 + $0x6] sm:$0x1] }
  0x21   :  { %v91_v12 = vld [vmem:[#allocation5 + $0x7] sm:$0x1]  ;;  %v49_v24 = vld [vmem:[#allocation5 + $0x1] sm:$0x1]  ;;  %v56_v31 = vld [vmem:[#allocation5 + $0x2] sm:$0x1] }
  0x22   :  { %v63_v38 = vld [vmem:[#allocation5 + $0x3] sm:$0x1]  ;;  %s125_s1 = sld [smem:[#allocation4 + $0x4]]  ;;  %s126_s6 = sld [smem:[#allocation4 + $0x5]] }
  0x23   :  { %s210_s7 = smov [#allocation8]  }
  0x24   :  { %v39_v2 = vstv %s26_s30  ;;  %v43_v3 = vstv %s122_s3  ;;  %s113_s8 = sshll.u32 %s210_s7, 4  ;;  %s114_s8 = int_to_ptr.vmem [resolvable:$true] %s113_s8 }
  0x25   :  { %v40_v5 = vmul.f32 %v39_v2, %v38_v1  ;;  %v41_v6 = vstv %s123_s4  ;;  %v71_v9 = vmul.f32 %v70_v7, %v39_v2  ;;  %v78_v14 = vmul.f32 %v77_v10, %v39_v2  ;;  %s179_s9 = scalar_lea.vmem %s114_s8, 16  ;;  %s183_s10 = scalar_lea.vmem %s114_s8, 32 }
  0x26   :  { %v37_v4 = vld [vmem:[#allocation2] sm:$0x1]  ;;  %v85_v15 = vmul.f32 %v84_v11, %v39_v2  ;;  %v46_v16 = vstv %s124_s5  ;;  %v92_v18 = vmul.f32 %v91_v12, %v39_v2  ;;  %v50_v25 = vmul.f32 %v49_v24, %v39_v2  ;;  %p180_p11 = scmp.ne.s32.totalorder %s114_s8, %s179_s9  ;;  %p184_p12 = scmp.lt.s32.totalorder %s114_s8, %s114_s8 }
  0x27   :  { %v44_v8 = vmul.f32 %v43_v3, %v37_v4  ;;  %v42_v13 = vadd.f32 %v41_v6, %v40_v5  ;;  %v72_v17 = vadd.f32 %v71_v9, %v41_v6  ;;  %v79_v20 = vadd.f32 %v78_v14, %v41_v6  ;;  %p185_p13 = scmp.lt.s32.totalorder %s183_s10, %s179_s9 }
  0x28   :  { %v86_v21 = vadd.f32 %v85_v15, %v41_v6  ;;  %v93_v22 = vadd.f32 %v92_v18, %v41_v6  ;;  %v51_v26 = vadd.f32 %v50_v25, %v41_v6  ;;  %v57_v32 = vmul.f32 %v56_v31, %v39_v2 }
  0x29   :  { %v45_v19 = vadd.f32 %v44_v8, %v42_v13  ;;  %v64_v39 = vmul.f32 %v63_v38, %v39_v2  ;;  %v102_v61 = vstv %s125_s1  ;;  %v104_v63 = vstv %s126_s6  ;;  %p186_p0 = por %p185_p13, %p184_p12 }
  0x2a   :  { %v58_v33 = vadd.f32 %v57_v32, %v41_v6 }
  0x2b   :  { %v47_v23 = vadd.f32 %v46_v16, %v45_v19  ;;  %v65_v40 = vadd.f32 %v64_v39, %v41_v6  ;;  %p187_p1 = pnand %p186_p0, %p180_p11 }
  0x2d   :  { %131 = vtanh.f32 %v47_v23 }
  0x37   :  { %v132_v27 = vpop.eup %131 }
  0x38   :  { %v52_v28 = vmul.f32 %v132_v27, %v43_v3 }
  0x3a   :  { %v53_v29 = vadd.f32 %v52_v28, %v51_v26 }
  0x3c   :  { %v54_v30 = vadd.f32 %v53_v29, %v46_v16 }
  0x3e   :  { %133 = vtanh.f32 %v54_v30 }
  0x48   :  { %v134_v34 = vpop.eup %133 }
  0x49   :  { %v59_v35 = vmul.f32 %v134_v34, %v43_v3 }
  0x4b   :  { %v60_v36 = vadd.f32 %v59_v35, %v58_v33 }
  0x4d   :  { %v61_v37 = vadd.f32 %v60_v36, %v46_v16 }
  0x4f   :  { %135 = vtanh.f32 %v61_v37 }
  0x59   :  { %v136_v41 = vpop.eup %135 }
  0x5a   :  { %v66_v42 = vmul.f32 %v136_v41, %v43_v3 }
  0x5c   :  { %v67_v43 = vadd.f32 %v66_v42, %v65_v40 }
  0x5e   :  { %v68_v44 = vadd.f32 %v67_v43, %v46_v16 }
  0x60   :  { %137 = vtanh.f32 %v68_v44 }
  0x6a   :  { %v138_v45 = vpop.eup %137 }
  0x6b   :  { %v73_v46 = vmul.f32 %v138_v45, %v43_v3 }
  0x6d   :  { %v74_v47 = vadd.f32 %v73_v46, %v72_v17 }
  0x6f   :  { %v75_v48 = vadd.f32 %v74_v47, %v46_v16 }
  0x71   :  { %139 = vtanh.f32 %v75_v48 }
  0x7b   :  { %v140_v49 = vpop.eup %139 }
  0x7c   :  { %v80_v50 = vmul.f32 %v140_v49, %v43_v3 }
  0x7e   :  { %v81_v51 = vadd.f32 %v80_v50, %v79_v20 }
  0x80   :  { %v82_v52 = vadd.f32 %v81_v51, %v46_v16 }
  0x82   :  { %141 = vtanh.f32 %v82_v52 }
  0x8c   :  { %v142_v53 = vpop.eup %141 }
  0x8d   :  { %v87_v54 = vmul.f32 %v142_v53, %v43_v3 }
  0x8f   :  { %v88_v55 = vadd.f32 %v87_v54, %v86_v21 }
  0x91   :  { %v89_v56 = vadd.f32 %v88_v55, %v46_v16 }
  0x93   :  { %143 = vtanh.f32 %v89_v56 }
  0x9d   :  { %v144_v57 = vpop.eup %143 }
  0x9e   :  { %v94_v58 = vmul.f32 %v144_v57, %v43_v3 }
  0xa0   :  { %v95_v59 = vadd.f32 %v94_v58, %v93_v22 }
  0xa2   :  { %v96_v60 = vadd.f32 %v95_v59, %v46_v16 }
  0xa4   :  { %145 = vtanh.f32 %v96_v60 }
  0xae   :  { %v146_v62 = vpop.eup %145 }
  0xaf   :  { %98 = vst [vmem:[#allocation2] sm:$0x1] %v146_v62  ;;  %v103_v0 = vmul.f32 %v146_v62, %v102_v61 }
  0xb1   :  { %v105_v1 = vadd.f32 %v104_v63, %v103_v0 }
  0xb3   :  { %106 = vst [vmem:[#allocation8] sm:$0x1] %v105_v1 }
  0xb4   :  { %190 = shalt.err (!%p187_p1)
}
  0xb5   :  { %s191_s13 = scalar_lea.hbm %s264_s2, 16 }
  0xb6   :  { %p192_p2 = scmp.ne.s32.totalorder %s264_s2, %s191_s13  ;;  %p195_p3 = scmp.lt.u32.totalorder %s191_s13, %s264_s2 }
  0xb8   :  { %p197_p4 = pnand %p195_p3, %p192_p2 }
  0xba   :  { %200 = shalt.err (!%p197_p4)
}
  0xbb   :  { %116 = dma.vmem_to_hbm [thread:$0]  %s114_s8, 16, %s264_s2, [#allocation7]  }
  0xbc   :  { %205 = dma.done.wait [#allocation7], 16  }
  0xbd   :  { %206 = vsyncadd [#allocation7], 4294967280 }
  0xbe   :  { %120 = vsyncpa [#allocation6], 1 }
  0xbf   :  { %121 = vsyncpa [#allocation7], 1 }

</bundles_post_ra>
